<compile_context>
chip_gen: v7x
topology: tpu7x:2x2x1
jax: 0.10.0
libtpu: 0.0.40
codegen_flags: <defaults>
</compile_context>

<pallas_src>
import functools

import jax
import jax.numpy as jnp
from jax.experimental import pallas as pl
from jax.experimental.pallas import tpu as pltpu


def _dice_partials_kernel(x_ref, t_ref, inter_ref, sx_ref, st_ref,
                          *, rows_total, rows_per_block, need_mask):
    """One grid step: per-batch, per-lane partial sums of one row-block."""
    x = x_ref[...].astype(jnp.float32)   # (B, TR, 128)
    t = t_ref[...].astype(jnp.float32)   # (B, TR, 128)

    if need_mask:
        # Last block may extend past the real row count; zero the tail rows
        # of BOTH operands before every sum.
        p = pl.program_id(0)
        row_ids = p * rows_per_block + jax.lax.broadcasted_iota(
            jnp.int32, x.shape, dimension=1)
        valid = row_ids < rows_total
        x = jnp.where(valid, x, 0.0)
        t = jnp.where(valid, t, 0.0)

    # Reduce only over the sublane (row) axis; keep the 128-lane axis so the
    # outputs stay lane-dense and the cross-lane reduce is deferred to the
    # tiny JAX epilogue.
    inter_ref[...] = jnp.sum(x * t, axis=1)[None, :, :]   # (1, B, 128)
    sx_ref[...] = jnp.sum(x, axis=1)[None, :, :]          # (1, B, 128)
    st_ref[...] = jnp.sum(t, axis=1)[None, :, :]          # (1, B, 128)


@jax.jit
def dice_loss(x, targets):
    """Pallas dice loss. x, targets: (B, C, H, W) (or any (B, ...))."""
    assert x.shape == targets.shape
    b = x.shape[0]
    xf = x.reshape(b, -1)
    tf = targets.reshape(b, -1)
    n = xf.shape[1]

    # Lane-dense layout: view each batch row as (rows, 128).  The reshape is a
    # free bitcast when n % 128 == 0 (the common CHW case).
    pad = (-n) % 128
    if pad:
        # TODO(synk): rare path (n not a multiple of 128) costs one extra HBM
        # pass; zeros do not change any of the three sums.
        xf = jnp.pad(xf, ((0, 0), (0, pad)))
        tf = jnp.pad(tf, ((0, 0), (0, pad)))
    rows = (n + pad) // 128
    x3 = xf.reshape(b, rows, 128)
    t3 = tf.reshape(b, rows, 128)

    # Row-block size: target ~2 MiB per input block (2 inputs x 2 buffers
    # ~= 8 MiB, under every generation's scoped-VMEM default), sublane
    # multiple of 8.
    itemsize = jnp.dtype(x.dtype).itemsize
    target_block_bytes = 2 * 1024 * 1024
    tr = max(8, (target_block_bytes // (b * 128 * itemsize)) // 8 * 8)
    if rows < 8:
        tr = rows                       # block dim == full dim is allowed
    else:
        tr = min(tr, rows // 8 * 8)     # multiple of 8, <= rows
    num_blocks = pl.cdiv(rows, tr)
    need_mask = (rows % tr) != 0

    kernel = functools.partial(
        _dice_partials_kernel,
        rows_total=rows, rows_per_block=tr, need_mask=need_mask)

    part_shape = jax.ShapeDtypeStruct((num_blocks, b, 128), jnp.float32)
    part_spec = pl.BlockSpec((1, b, 128), lambda p: (p, 0, 0))
    in_spec = pl.BlockSpec((b, tr, 128), lambda p: (0, p, 0))

    inter_p, sx_p, st_p = pl.pallas_call(
        kernel,
        out_shape=(part_shape, part_shape, part_shape),
        grid=(num_blocks,),
        in_specs=[in_spec, in_spec],
        out_specs=(part_spec, part_spec, part_spec),
        compiler_params=pltpu.CompilerParams(
            dimension_semantics=("parallel",)),
    )(x3, t3)

    # Tiny epilogue: cross-lane / cross-block reduce, per-batch dice, mean.
    inter = jnp.sum(inter_p, axis=(0, 2))   # (B,)
    sx = jnp.sum(sx_p, axis=(0, 2))         # (B,)
    st = jnp.sum(st_p, axis=(0, 2))         # (B,)
    dice = jnp.mean(2.0 * inter / (sx + st))
    return 1.0 - dice


def _dice_loss_ref(x, targets):
    """Pure-JAX reference mirroring the PyTorch module."""
    b = x.shape[0]
    xf = x.reshape(b, -1).astype(jnp.float32)
    tf = targets.reshape(b, -1).astype(jnp.float32)
    inter = jnp.sum(xf * tf, axis=1)
    dice = jnp.sum(2.0 * inter / (jnp.sum(xf, axis=1) + jnp.sum(tf, axis=1))) / b
    return 1.0 - dice


if __name__ == "__main__":
    key = jax.random.PRNGKey(0)
    kx, kt = jax.random.split(key)
    B, C, H, W = 2, 4, 16, 16
    # Probability-like predictions and binary-ish targets (as dice loss expects).
    x = jax.nn.sigmoid(jax.random.normal(kx, (B, C, H, W), dtype=jnp.float32))
    targets = (jax.random.uniform(kt, (B, C, H, W)) > 0.5).astype(jnp.float32)

    loss = dice_loss(x, targets)
    jax.block_until_ready(loss)

    ref = _dice_loss_ref(x, targets)
    assert jnp.allclose(loss, ref, rtol=1e-5, atol=1e-5), (loss, ref)
    print("KERNEL_OK")
</pallas_src>

<mosaic_0001>
module attributes {stable_mosaic.version = 11 : i64} {
  func.func @_dice_partials_kernel(%arg0: i32, %arg1: memref<2x8x128xf32, #tpu.memory_space<vmem>>, %arg2: memref<2x8x128xf32, #tpu.memory_space<vmem>>, %arg3: memref<1x2x128xf32, #tpu.memory_space<vmem>>, %arg4: memref<1x2x128xf32, #tpu.memory_space<vmem>>, %arg5: memref<1x2x128xf32, #tpu.memory_space<vmem>>) attributes {dimension_semantics = [#tpu.dimension_semantics<parallel>], iteration_bounds = array<i64: 1>, scalar_prefetch = 0 : i64, scratch_operands = 0 : i64, tpu.core_type = #tpu.core_type<tc>, window_params = [{transform_indices = @transform_0, window_bounds = array<i64: 2, 8, 128>}, {transform_indices = @transform_1, window_bounds = array<i64: 2, 8, 128>}, {transform_indices = @transform_2, window_bounds = array<i64: 1, 2, 128>}, {transform_indices = @transform_3, window_bounds = array<i64: 1, 2, 128>}, {transform_indices = @transform_4, window_bounds = array<i64: 1, 2, 128>}]} {
    %c0 = arith.constant 0 : index
    %c0_0 = arith.constant 0 : index
    %c0_1 = arith.constant 0 : index
    %0 = vector.load %arg1[%c0, %c0_0, %c0_1] : memref<2x8x128xf32, #tpu.memory_space<vmem>>, vector<2x8x128xf32>
    %c0_2 = arith.constant 0 : index
    %c0_3 = arith.constant 0 : index
    %c0_4 = arith.constant 0 : index
    %1 = vector.load %arg2[%c0_2, %c0_3, %c0_4] : memref<2x8x128xf32, #tpu.memory_space<vmem>>, vector<2x8x128xf32>
    %2 = arith.mulf %0, %1 : vector<2x8x128xf32>
    %cst = arith.constant dense<0.000000e+00> : vector<2x128xf32>
    %3 = vector.multi_reduction <add>, %2, %cst [1] : vector<2x8x128xf32> to vector<2x128xf32>
    %4 = vector.shape_cast %3 : vector<2x128xf32> to vector<1x2x128xf32>
    %c0_5 = arith.constant 0 : index
    %c0_6 = arith.constant 0 : index
    %c0_7 = arith.constant 0 : index
    %5 = vector.load %arg3[%c0_5, %c0_6, %c0_7] : memref<1x2x128xf32, #tpu.memory_space<vmem>>, vector<1x2x128xf32>
    tpu.vector_store %arg3[%c0_5, %c0_6, %c0_7], %4 {strides = array<i32>} : memref<1x2x128xf32, #tpu.memory_space<vmem>>, vector<1x2x128xf32>,
    %cst_8 = arith.constant dense<0.000000e+00> : vector<2x128xf32>
    %6 = vector.multi_reduction <add>, %0, %cst_8 [1] : vector<2x8x128xf32> to vector<2x128xf32>
    %7 = vector.shape_cast %6 : vector<2x128xf32> to vector<1x2x128xf32>
    %c0_9 = arith.constant 0 : index
    %c0_10 = arith.constant 0 : index
    %c0_11 = arith.constant 0 : index
    %8 = vector.load %arg4[%c0_9, %c0_10, %c0_11] : memref<1x2x128xf32, #tpu.memory_space<vmem>>, vector<1x2x128xf32>
    tpu.vector_store %arg4[%c0_9, %c0_10, %c0_11], %7 {strides = array<i32>} : memref<1x2x128xf32, #tpu.memory_space<vmem>>, vector<1x2x128xf32>,
    %cst_12 = arith.constant dense<0.000000e+00> : vector<2x128xf32>
    %9 = vector.multi_reduction <add>, %1, %cst_12 [1] : vector<2x8x128xf32> to vector<2x128xf32>
    %10 = vector.shape_cast %9 : vector<2x128xf32> to vector<1x2x128xf32>
    %c0_13 = arith.constant 0 : index
    %c0_14 = arith.constant 0 : index
    %c0_15 = arith.constant 0 : index
    %11 = vector.load %arg5[%c0_13, %c0_14, %c0_15] : memref<1x2x128xf32, #tpu.memory_space<vmem>>, vector<1x2x128xf32>
    tpu.vector_store %arg5[%c0_13, %c0_14, %c0_15], %10 {strides = array<i32>} : memref<1x2x128xf32, #tpu.memory_space<vmem>>, vector<1x2x128xf32>,
    return
  }
  func.func @transform_0(%arg0: i32) -> (i32, i32, i32) {
    %c0_i32 = arith.constant 0 : i32
    %c0_i32_0 = arith.constant 0 : i32
    %c0_i32_1 = arith.constant 0 : i32
    return %c0_i32, %arg0, %c0_i32_0 : i32, i32, i32
  }
  func.func @transform_1(%arg0: i32) -> (i32, i32, i32) {
    %c0_i32 = arith.constant 0 : i32
    %c0_i32_0 = arith.constant 0 : i32
    %c0_i32_1 = arith.constant 0 : i32
    return %c0_i32, %arg0, %c0_i32_0 : i32, i32, i32
  }
  func.func @transform_2(%arg0: i32) -> (i32, i32, i32) {
    %c0_i32 = arith.constant 0 : i32
    %c0_i32_0 = arith.constant 0 : i32
    %c0_i32_1 = arith.constant 0 : i32
    return %arg0, %c0_i32, %c0_i32_0 : i32, i32, i32
  }
  func.func @transform_3(%arg0: i32) -> (i32, i32, i32) {
    %c0_i32 = arith.constant 0 : i32
    %c0_i32_0 = arith.constant 0 : i32
    %c0_i32_1 = arith.constant 0 : i32
    return %arg0, %c0_i32, %c0_i32_0 : i32, i32, i32
  }
  func.func @transform_4(%arg0: i32) -> (i32, i32, i32) {
    %c0_i32 = arith.constant 0 : i32
    %c0_i32_0 = arith.constant 0 : i32
    %c0_i32_1 = arith.constant 0 : i32
    return %arg0, %c0_i32, %c0_i32_0 : i32, i32, i32
  }
}

</mosaic_0001>

<bundles_post_ra>
// kernel: dice_loss.1
= control target key start
LH: loop header
LB: loop body
LE: loop exit
PB: predicated region body
PF: predicated region fallthrough
CT: control target
= control target key end

     0   :  { %vm34_vm0 = vcmask 1041409   ;;  %s133_s0 = inlined_call_operand.vmem [shape: f32[2,8,128], index: 0, kind: input, shape index: {}]   ;;  %s134_s1 = inlined_call_operand.vmem [shape: f32[2,8,128], index: 1, kind: input, shape index: {}]   ;;  %s135_s3 = inlined_call_operand.vmem [shape: f32[1,2,128], index: 3, kind: output, shape index: {1}]   ;;  %s136_s4 = inlined_call_operand.vmem [shape: f32[1,2,128], index: 4, kind: output, shape index: {2}]   ;;  %s137_s2 = inlined_call_operand.vmem [shape: f32[1,2,128], index: 2, kind: output, shape index: {0}]  }
   0x1   :  { %v14_v0 = vld [vmem:[%s133_s0] sm:$0xff]  ;;  %v15_v1 = vld [vmem:[%s133_s0 + $0x8] sm:$0xff] }
   0x2   :  { %v16_v2 = vld [vmem:[%s134_s1] sm:$0xff]  ;;  %v17_v3 = vld [vmem:[%s134_s1 + $0x8] sm:$0xff]  ;;  %v38_v5 = vrot.slane %v14_v0, 4  ;;  %v44_v6 = vrot.slane %v15_v1, 4 }
   0x3   :  { %v18_v4 = vmul.f32 %v16_v2, %v14_v0  ;;  %v55_v7 = vrot.slane %v16_v2, 4  ;;  %v19_v8 = vmul.f32 %v17_v3, %v15_v1  ;;  %v61_v9 = vrot.slane %v17_v3, 4 }
   0x4   :  { %v39_v11 = vadd.f32 %v38_v5, %v14_v0  ;;  %v45_v12 = vadd.f32 %v44_v6, %v15_v1 }
   0x5   :  { %v20_v10 = vrot.slane %v18_v4, 4  ;;  %v56_v13 = vadd.f32 %v55_v7, %v16_v2  ;;  %v26_v14 = vrot.slane %v19_v8, 4  ;;  %v62_v15 = vadd.f32 %v61_v9, %v17_v3 }
   0x6   :  { %v40_v17 = vrot.slane %v39_v11, 2  ;;  %v46_v18 = vrot.slane %v45_v12, 2 }
   0x7   :  { %v21_v16 = vadd.f32 %v20_v10, %v18_v4  ;;  %v57_v19 = vrot.slane %v56_v13, 2  ;;  %v27_v20 = vadd.f32 %v26_v14, %v19_v8  ;;  %v63_v21 = vrot.slane %v62_v15, 2 }
   0x8   :  { %v41_v23 = vadd.f32 %v40_v17, %v39_v11  ;;  %v47_v24 = vadd.f32 %v46_v18, %v45_v12 }
   0x9   :  { %v22_v22 = vrot.slane %v21_v16, 2  ;;  %v58_v25 = vadd.f32 %v57_v19, %v56_v13  ;;  %v28_v26 = vrot.slane %v27_v20, 2  ;;  %v64_v27 = vadd.f32 %v63_v21, %v62_v15 }
   0xa   :  { %v42_v29 = vrot.slane %v41_v23, 1  ;;  %v48_v30 = vrot.slane %v47_v24, 1 }
   0xb   :  { %v23_v28 = vadd.f32 %v22_v22, %v21_v16  ;;  %v59_v31 = vrot.slane %v58_v25, 1  ;;  %v29_v32 = vadd.f32 %v28_v26, %v27_v20  ;;  %v65_v33 = vrot.slane %v64_v27, 1 }
   0xc   :  { %v43_v35 = vadd.f32 %v42_v29, %v41_v23  ;;  %v49_v36 = vadd.f32 %v48_v30, %v47_v24 }
   0xd   :  { %v24_v34 = vrot.slane %v23_v28, 1  ;;  %v60_v37 = vadd.f32 %v59_v31, %v58_v25  ;;  %v30_v38 = vrot.slane %v29_v32, 1  ;;  %v66_v39 = vadd.f32 %v65_v33, %v64_v27 }
   0xe   :  { %v52_v41 = vsel %vm34_vm0, %v49_v36, %v43_v35 }
   0xf   :  { %v25_v40 = vadd.f32 %v24_v34, %v23_v28  ;;  %v31_v42 = vadd.f32 %v30_v38, %v29_v32  ;;  %54 = vst [vmem:[%s135_s3] sm:$0x3] %v52_v41  ;;  %v69_v43 = vsel %vm34_vm0, %v66_v39, %v60_v37 }
  0x10   :  { %71 = vst [vmem:[%s136_s4] sm:$0x3] %v69_v43 }
  0x11   :  { %v35_v44 = vsel %vm34_vm0, %v31_v42, %v25_v40 }
  0x12   :  { %37 = vst [vmem:[%s137_s2] sm:$0x3] %v35_v44 }

</bundles_post_ra>
